<compile_context>
chip_gen: v6e
topology: v6e:2x2x1
jax: 0.10.0
libtpu: 0.0.40
codegen_flags: <defaults>
</compile_context>

<pallas_src>
import jax
import jax.numpy as jnp
from jax.experimental import pallas as pl
from jax.experimental.pallas import tpu as pltpu


# --------------------------------------------------------------------------- #
# Kernel
# --------------------------------------------------------------------------- #
def attention_fusion_kernel(
    a_ref, v_ref, p_ref,                         # aggregated activations (Bt, D*)
    wa_ref, ba_ref,                              # audio_proj
    wv_ref, bv_ref,                              # video_proj
    wp_ref, bp_ref,                              # pers_proj
    ws1_ref, bs1_ref, ws2_ref, bs2_ref,          # attention_scorer
    wf_ref, bf_ref,                              # fusion_layer
    wc_ref, bc_ref,                              # classifier
    out_ref,                                     # logits (Bt, C_pad)
):
    f32 = jnp.float32
    bt = a_ref.shape[0]

    # --- modality projections (lane-dense, K/N padded to 128) ----------------
    a_proj = jnp.dot(a_ref[...], wa_ref[...], preferred_element_type=f32) + ba_ref[...]
    v_proj = jnp.dot(v_ref[...], wv_ref[...], preferred_element_type=f32) + bv_ref[...]
    p_proj = jnp.dot(p_ref[...], wp_ref[...], preferred_element_type=f32) + bp_ref[...]

    # --- attention scorer: one fused (3*Bt, P) @ (P, H) matmul ---------------
    stacked = jnp.concatenate([a_proj, v_proj, p_proj], axis=0)          # (3*Bt, P)
    h = jnp.tanh(
        jnp.dot(stacked, ws1_ref[...], preferred_element_type=f32) + bs1_ref[...]
    )
    # second scorer layer has N=1: VPU multiply + lane reduction, skip the MXU
    s_all = jnp.sum(h * ws2_ref[...], axis=-1, keepdims=True) + bs2_ref[...]  # (3*Bt,1)
    s_a = s_all[0:bt]
    s_v = s_all[bt:2 * bt]
    s_p = s_all[2 * bt:3 * bt]

    # --- softmax over the 3 modalities ---------------------------------------
    m = jnp.maximum(jnp.maximum(s_a, s_v), s_p)
    e_a = jnp.exp(s_a - m)
    e_v = jnp.exp(s_v - m)
    e_p = jnp.exp(s_p - m)
    denom = e_a + e_v + e_p
    inv = pl.reciprocal(denom, approx=True)
    inv = inv * (2.0 - denom * inv)        # one Newton step -> ~f32-exact, still cheap
    w_a = e_a * inv
    w_v = e_v * inv
    w_p = e_p * inv

    # --- attention-weighted fusion -------------------------------------------
    context = w_a * a_proj + w_v * v_proj + w_p * p_proj                 # (Bt, P)

    # --- fusion MLP (ReLU; dropout = identity) + classifier ------------------
    fused = jnp.maximum(
        jnp.dot(context, wf_ref[...], preferred_element_type=f32) + bf_ref[...], 0.0
    )
    logits = jnp.dot(fused, wc_ref[...], preferred_element_type=f32) + bc_ref[...]
    out_ref[...] = logits.astype(out_ref.dtype)


# --------------------------------------------------------------------------- #
# Wrapper
# --------------------------------------------------------------------------- #
_LANE = 128
_SUBLANE = 8


def _round_up(x, m):
    return (x + m - 1) // m * m


def _pad_last(x, target):
    pad = target - x.shape[-1]
    if pad == 0:
        return x
    return jnp.pad(x, [(0, 0)] * (x.ndim - 1) + [(0, pad)])


def _pad_rows(x, target):
    pad = target - x.shape[0]
    if pad == 0:
        return x
    return jnp.pad(x, [(0, pad)] + [(0, 0)] * (x.ndim - 1))


def attention_fusion_mlp(a_feat, v_feat, p_feat, params, *, batch_tile=None):
    """a_feat (B,Ta,Da) or (B,Da), v_feat (B,Tv,Dv) or (B,Dv), p_feat (B,Dp) -> (B,C)."""
    # Aggregate over the sequence axis in XLA (keeps kernel VMEM at Bt*D, not Bt*T*D).
    a_agg = jnp.mean(a_feat, axis=1) if a_feat.ndim == 3 else a_feat
    v_agg = jnp.mean(v_feat, axis=1) if v_feat.ndim == 3 else v_feat
    if p_feat.ndim == 1:
        p_feat = p_feat[None, :]

    B = p_feat.shape[0]
    num_classes = params["wc"].shape[1]

    # Padded (lane-dense) dimensions.
    da_pad = _round_up(a_agg.shape[1], _LANE)
    dv_pad = _round_up(v_agg.shape[1], _LANE)
    dp_pad = _round_up(p_feat.shape[1], _LANE)
    proj_pad = _round_up(params["wa"].shape[1], _LANE)
    att_pad = _round_up(params["ws1"].shape[1], _LANE)
    fus_pad = _round_up(params["wf"].shape[1], _LANE)
    cls_pad = _round_up(num_classes, _LANE)

    # Batch tile (multiple of 8 sublanes); pad batch to a whole number of tiles.
    if batch_tile is None:
        batch_tile = min(128, _round_up(B, _SUBLANE))
    bt = _round_up(batch_tile, _SUBLANE)
    b_padded = _round_up(B, bt)
    grid = (b_padded // bt,)

    # Zero-pad activations (padded rows/cols stay zero and are sliced away).
    a_in = _pad_rows(_pad_last(a_agg.astype(jnp.float32), da_pad), b_padded)
    v_in = _pad_rows(_pad_last(v_agg.astype(jnp.float32), dv_pad), b_padded)
    p_in = _pad_rows(_pad_last(p_feat.astype(jnp.float32), dp_pad), b_padded)

    def pad_w(w, din, dout):
        w = w.astype(jnp.float32)
        return jnp.pad(w, ((0, din - w.shape[0]), (0, dout - w.shape[1])))

    def pad_b(b, dout):
        b = b.astype(jnp.float32).reshape(1, -1)
        return jnp.pad(b, ((0, 0), (0, dout - b.shape[1])))

    wa_p = pad_w(params["wa"], da_pad, proj_pad); ba_p = pad_b(params["ba"], proj_pad)
    wv_p = pad_w(params["wv"], dv_pad, proj_pad); bv_p = pad_b(params["bv"], proj_pad)
    wpr_p = pad_w(params["wp"], dp_pad, proj_pad); bpr_p = pad_b(params["bp"], proj_pad)
    ws1_p = pad_w(params["ws1"], proj_pad, att_pad); bs1_p = pad_b(params["bs1"], att_pad)
    ws2_p = pad_b(params["ws2"].reshape(1, -1), att_pad)     # (1, att_pad) row vector
    bs2_p = params["bs2"].astype(jnp.float32).reshape(1, 1)  # scalar bias (1, 1)
    wf_p = pad_w(params["wf"], proj_pad, fus_pad); bf_p = pad_b(params["bf"], fus_pad)
    wc_p = pad_w(params["wc"], fus_pad, cls_pad); bc_p = pad_b(params["bc"], cls_pad)

    operands = (
        a_in, v_in, p_in,
        wa_p, ba_p, wv_p, bv_p, wpr_p, bpr_p,
        ws1_p, bs1_p, ws2_p, bs2_p,
        wf_p, bf_p, wc_p, bc_p,
    )

    def act_spec(d):
        return pl.BlockSpec((bt, d), lambda i: (i, 0))

    def resident_spec(arr):
        # Full array as one block; same block index every step -> DMA'd once.
        return pl.BlockSpec(arr.shape, lambda i: (0, 0))

    in_specs = [act_spec(da_pad), act_spec(dv_pad), act_spec(dp_pad)]
    in_specs += [resident_spec(x) for x in operands[3:]]
    out_spec = pl.BlockSpec((bt, cls_pad), lambda i: (i, 0))

    out_padded = pl.pallas_call(
        attention_fusion_kernel,
        out_shape=jax.ShapeDtypeStruct((b_padded, cls_pad), jnp.float32),
        grid_spec=pltpu.PrefetchScalarGridSpec(
            num_scalar_prefetch=0,
            grid=grid,
            in_specs=in_specs,
            out_specs=out_spec,
        ),
        compiler_params=pltpu.CompilerParams(
            dimension_semantics=("parallel",),
            vmem_limit_bytes=32 * 1024 * 1024,
        ),
    )(*operands)

    return out_padded[:B, :num_classes]


# --------------------------------------------------------------------------- #
# Parameters & pure-JAX reference
# --------------------------------------------------------------------------- #
def init_params(key, audio_dim, video_dim, pers_dim, projection_dim,
                fusion_hidden_dim, num_classes):
    """Deterministic synthetic parameters. Weights stored as (in, out)."""
    att_hidden = max(projection_dim // 2, 1)
    keys = jax.random.split(key, 16)

    def lin(kw, kb, din, dout):
        scale = 1.0 / jnp.sqrt(jnp.float32(din))
        w = jax.random.uniform(kw, (din, dout), jnp.float32, -scale, scale)
        b = jax.random.uniform(kb, (1, dout), jnp.float32, -scale, scale)
        return w, b

    wa, ba = lin(keys[0], keys[1], audio_dim, projection_dim)
    wv, bv = lin(keys[2], keys[3], video_dim, projection_dim)
    wp, bp = lin(keys[4], keys[5], pers_dim, projection_dim)
    ws1, bs1 = lin(keys[6], keys[7], projection_dim, att_hidden)
    ws2, bs2 = lin(keys[8], keys[9], att_hidden, 1)
    wf, bf = lin(keys[10], keys[11], projection_dim, fusion_hidden_dim)
    wc, bc = lin(keys[12], keys[13], fusion_hidden_dim, num_classes)

    return dict(wa=wa, ba=ba, wv=wv, bv=bv, wp=wp, bp=bp,
                ws1=ws1, bs1=bs1, ws2=ws2, bs2=bs2,
                wf=wf, bf=bf, wc=wc, bc=bc)


def reference_forward(a_feat, v_feat, p_feat, params):
    """Pure-JAX reference mirroring the PyTorch forward (eval mode)."""
    a = jnp.mean(a_feat, axis=1) if a_feat.ndim == 3 else a_feat
    v = jnp.mean(v_feat, axis=1) if v_feat.ndim == 3 else v_feat
    ap = a @ params["wa"] + params["ba"]
    vp = v @ params["wv"] + params["bv"]
    pp = p_feat @ params["wp"] + params["bp"]

    def score(x):
        h = jnp.tanh(x @ params["ws1"] + params["bs1"])
        return h @ params["ws2"] + params["bs2"]

    scores = jnp.stack([score(ap), score(vp), score(pp)], axis=1)   # (B,3,1)
    w = jax.nn.softmax(scores, axis=1)
    proj = jnp.stack([ap, vp, pp], axis=1)                          # (B,3,P)
    ctx = jnp.sum(w * proj, axis=1)
    fused = jax.nn.relu(ctx @ params["wf"] + params["bf"])
    return fused @ params["wc"] + params["bc"]


# --------------------------------------------------------------------------- #
# Test
# --------------------------------------------------------------------------- #
if __name__ == "__main__":
    key = jax.random.PRNGKey(0)
    k_a, k_v, k_p, k_par, k_a2, k_v2, k_p2 = jax.random.split(key, 7)

    # Primary, module-consistent small shapes.
    B, seq = 2, 8
    audio_dim, video_dim, pers_dim = 16, 24, 8
    projection_dim, fusion_hidden_dim, num_classes = 32, 64, 4

    a_feat = jax.random.normal(k_a, (B, seq, audio_dim), jnp.float32)
    v_feat = jax.random.normal(k_v, (B, seq, video_dim), jnp.float32)
    p_feat = jax.random.normal(k_p, (B, pers_dim), jnp.float32)

    params = init_params(k_par, audio_dim, video_dim, pers_dim,
                         projection_dim, fusion_hidden_dim, num_classes)

    logits = jax.block_until_ready(attention_fusion_mlp(a_feat, v_feat, p_feat, params))
    ref = reference_forward(a_feat, v_feat, p_feat, params)
    assert logits.shape == (B, num_classes)
    assert jnp.allclose(logits, ref, atol=1e-4, rtol=1e-4)

    # Second case: exercises grid > 1 (batch tiling, padding + slicing).
    B2, seq2 = 20, 4
    a2 = jax.random.normal(k_a2, (B2, seq2, audio_dim), jnp.float32)
    v2 = jax.random.normal(k_v2, (B2, seq2, video_dim), jnp.float32)
    p2 = jax.random.normal(k_p2, (B2, pers_dim), jnp.float32)
    logits2 = jax.block_until_ready(
        attention_fusion_mlp(a2, v2, p2, params, batch_tile=8))
    ref2 = reference_forward(a2, v2, p2, params)
    assert logits2.shape == (B2, num_classes)
    assert jnp.allclose(logits2, ref2, atol=1e-4, rtol=1e-4)

    print("KERNEL_OK")
</pallas_src>

<mosaic_0001>
module attributes {stable_mosaic.version = 11 : i64} {
  func.func @attention_fusion_kernel(%arg0: i32, %arg1: memref<8x128xf32, #tpu.memory_space<vmem>>, %arg2: memref<8x128xf32, #tpu.memory_space<vmem>>, %arg3: memref<8x128xf32, #tpu.memory_space<vmem>>, %arg4: memref<128x128xf32, #tpu.memory_space<vmem>>, %arg5: memref<1x128xf32, #tpu.memory_space<vmem>>, %arg6: memref<128x128xf32, #tpu.memory_space<vmem>>, %arg7: memref<1x128xf32, #tpu.memory_space<vmem>>, %arg8: memref<128x128xf32, #tpu.memory_space<vmem>>, %arg9: memref<1x128xf32, #tpu.memory_space<vmem>>, %arg10: memref<128x128xf32, #tpu.memory_space<vmem>>, %arg11: memref<1x128xf32, #tpu.memory_space<vmem>>, %arg12: memref<1x128xf32, #tpu.memory_space<vmem>>, %arg13: memref<1x1xf32, #tpu.memory_space<vmem>>, %arg14: memref<128x128xf32, #tpu.memory_space<vmem>>, %arg15: memref<1x128xf32, #tpu.memory_space<vmem>>, %arg16: memref<128x128xf32, #tpu.memory_space<vmem>>, %arg17: memref<1x128xf32, #tpu.memory_space<vmem>>, %arg18: memref<8x128xf32, #tpu.memory_space<vmem>>) attributes {dimension_semantics = [#tpu.dimension_semantics<parallel>], iteration_bounds = array<i64: 1>, scalar_prefetch = 0 : i64, scratch_operands = 0 : i64, tpu.core_type = #tpu.core_type<tc>, window_params = [{transform_indices = @transform_0, window_bounds = array<i64: 8, 128>}, {transform_indices = @transform_1, window_bounds = array<i64: 8, 128>}, {transform_indices = @transform_2, window_bounds = array<i64: 8, 128>}, {pipeline_mode = #tpu.pipeline_mode<synchronous>, transform_indices = @transform_3, window_bounds = array<i64: 128, 128>}, {pipeline_mode = #tpu.pipeline_mode<synchronous>, transform_indices = @transform_4, window_bounds = array<i64: 1, 128>}, {pipeline_mode = #tpu.pipeline_mode<synchronous>, transform_indices = @transform_5, window_bounds = array<i64: 128, 128>}, {pipeline_mode = #tpu.pipeline_mode<synchronous>, transform_indices = @transform_6, window_bounds = array<i64: 1, 128>}, {pipeline_mode = #tpu.pipeline_mode<synchronous>, transform_indices = @transform_7, window_bounds = array<i64: 128, 128>}, {pipeline_mode = #tpu.pipeline_mode<synchronous>, transform_indices = @transform_8, window_bounds = array<i64: 1, 128>}, {pipeline_mode = #tpu.pipeline_mode<synchronous>, transform_indices = @transform_9, window_bounds = array<i64: 128, 128>}, {pipeline_mode = #tpu.pipeline_mode<synchronous>, transform_indices = @transform_10, window_bounds = array<i64: 1, 128>}, {pipeline_mode = #tpu.pipeline_mode<synchronous>, transform_indices = @transform_11, window_bounds = array<i64: 1, 128>}, {pipeline_mode = #tpu.pipeline_mode<synchronous>, transform_indices = @transform_12, window_bounds = array<i64: 1, 1>}, {pipeline_mode = #tpu.pipeline_mode<synchronous>, transform_indices = @transform_13, window_bounds = array<i64: 128, 128>}, {pipeline_mode = #tpu.pipeline_mode<synchronous>, transform_indices = @transform_14, window_bounds = array<i64: 1, 128>}, {pipeline_mode = #tpu.pipeline_mode<synchronous>, transform_indices = @transform_15, window_bounds = array<i64: 128, 128>}, {pipeline_mode = #tpu.pipeline_mode<synchronous>, transform_indices = @transform_16, window_bounds = array<i64: 1, 128>}, {transform_indices = @transform_17, window_bounds = array<i64: 8, 128>}]} {
    %c0 = arith.constant 0 : index
    %c0_0 = arith.constant 0 : index
    %0 = vector.load %arg1[%c0, %c0_0] : memref<8x128xf32, #tpu.memory_space<vmem>>, vector<8x128xf32>
    %c0_1 = arith.constant 0 : index
    %c0_2 = arith.constant 0 : index
    %1 = vector.load %arg4[%c0_1, %c0_2] : memref<128x128xf32, #tpu.memory_space<vmem>>, vector<128x128xf32>
    %cst = arith.constant dense<0.000000e+00> : vector<8x128xf32>
    %2 = tpu.matmul %0, %1, %cst {dimension_numbers = #tpu.dot_dimension_numbers<[1], [0], [0], [1], [0, 0, 1, 1], [], []>} : vector<8x128xf32>, vector<128x128xf32>, vector<8x128xf32> -> vector<8x128xf32>
    %c0_3 = arith.constant 0 : index
    %c0_4 = arith.constant 0 : index
    %3 = vector.load %arg5[%c0_3, %c0_4] : memref<1x128xf32, #tpu.memory_space<vmem>>, vector<1x128xf32>
    %4 = vector.broadcast %3 : vector<1x128xf32> to vector<8x128xf32>
    %5 = arith.addf %2, %4 : vector<8x128xf32>
    %c0_5 = arith.constant 0 : index
    %c0_6 = arith.constant 0 : index
    %6 = vector.load %arg2[%c0_5, %c0_6] : memref<8x128xf32, #tpu.memory_space<vmem>>, vector<8x128xf32>
    %c0_7 = arith.constant 0 : index
    %c0_8 = arith.constant 0 : index
    %7 = vector.load %arg6[%c0_7, %c0_8] : memref<128x128xf32, #tpu.memory_space<vmem>>, vector<128x128xf32>
    %cst_9 = arith.constant dense<0.000000e+00> : vector<8x128xf32>
    %8 = tpu.matmul %6, %7, %cst_9 {dimension_numbers = #tpu.dot_dimension_numbers<[1], [0], [0], [1], [0, 0, 1, 1], [], []>} : vector<8x128xf32>, vector<128x128xf32>, vector<8x128xf32> -> vector<8x128xf32>
    %c0_10 = arith.constant 0 : index
    %c0_11 = arith.constant 0 : index
    %9 = vector.load %arg7[%c0_10, %c0_11] : memref<1x128xf32, #tpu.memory_space<vmem>>, vector<1x128xf32>
    %10 = vector.broadcast %9 : vector<1x128xf32> to vector<8x128xf32>
    %11 = arith.addf %8, %10 : vector<8x128xf32>
    %c0_12 = arith.constant 0 : index
    %c0_13 = arith.constant 0 : index
    %12 = vector.load %arg3[%c0_12, %c0_13] : memref<8x128xf32, #tpu.memory_space<vmem>>, vector<8x128xf32>
    %c0_14 = arith.constant 0 : index
    %c0_15 = arith.constant 0 : index
    %13 = vector.load %arg8[%c0_14, %c0_15] : memref<128x128xf32, #tpu.memory_space<vmem>>, vector<128x128xf32>
    %cst_16 = arith.constant dense<0.000000e+00> : vector<8x128xf32>
    %14 = tpu.matmul %12, %13, %cst_16 {dimension_numbers = #tpu.dot_dimension_numbers<[1], [0], [0], [1], [0, 0, 1, 1], [], []>} : vector<8x128xf32>, vector<128x128xf32>, vector<8x128xf32> -> vector<8x128xf32>
    %c0_17 = arith.constant 0 : index
    %c0_18 = arith.constant 0 : index
    %15 = vector.load %arg9[%c0_17, %c0_18] : memref<1x128xf32, #tpu.memory_space<vmem>>, vector<1x128xf32>
    %16 = vector.broadcast %15 : vector<1x128xf32> to vector<8x128xf32>
    %17 = arith.addf %14, %16 : vector<8x128xf32>
    %18 = tpu.concatenate %5, %11, %17 in 0 : vector<8x128xf32>, vector<8x128xf32>, vector<8x128xf32> -> vector<24x128xf32>
    %c0_19 = arith.constant 0 : index
    %c0_20 = arith.constant 0 : index
    %19 = vector.load %arg10[%c0_19, %c0_20] : memref<128x128xf32, #tpu.memory_space<vmem>>, vector<128x128xf32>
    %cst_21 = arith.constant dense<0.000000e+00> : vector<24x128xf32>
    %20 = tpu.matmul %18, %19, %cst_21 {dimension_numbers = #tpu.dot_dimension_numbers<[1], [0], [0], [1], [0, 0, 1, 1], [], []>} : vector<24x128xf32>, vector<128x128xf32>, vector<24x128xf32> -> vector<24x128xf32>
    %c0_22 = arith.constant 0 : index
    %c0_23 = arith.constant 0 : index
    %21 = vector.load %arg11[%c0_22, %c0_23] : memref<1x128xf32, #tpu.memory_space<vmem>>, vector<1x128xf32>
    %22 = vector.broadcast %21 : vector<1x128xf32> to vector<24x128xf32>
    %23 = arith.addf %20, %22 : vector<24x128xf32>
    %24 = math.tanh %23 : vector<24x128xf32>
    %c0_24 = arith.constant 0 : index
    %c0_25 = arith.constant 0 : index
    %25 = vector.load %arg12[%c0_24, %c0_25] : memref<1x128xf32, #tpu.memory_space<vmem>>, vector<1x128xf32>
    %26 = vector.broadcast %25 : vector<1x128xf32> to vector<24x128xf32>
    %27 = arith.mulf %24, %26 : vector<24x128xf32>
    %cst_26 = arith.constant dense<0.000000e+00> : vector<24xf32>
    %28 = vector.multi_reduction <add>, %27, %cst_26 [1] : vector<24x128xf32> to vector<24xf32>
    %29 = vector.shape_cast %28 : vector<24xf32> to vector<24x1xf32>
    %c0_27 = arith.constant 0 : index
    %c0_28 = arith.constant 0 : index
    %30 = vector.load %arg13[%c0_27, %c0_28] : memref<1x1xf32, #tpu.memory_space<vmem>>, vector<1x1xf32>
    %31 = vector.broadcast %30 : vector<1x1xf32> to vector<24x1xf32>
    %32 = arith.addf %29, %31 : vector<24x1xf32>
    %33 = vector.extract_strided_slice %32 {offsets = [0, 0], sizes = [8, 1], strides = [1, 1]} : vector<24x1xf32> to vector<8x1xf32>
    %34 = vector.extract_strided_slice %32 {offsets = [8, 0], sizes = [8, 1], strides = [1, 1]} : vector<24x1xf32> to vector<8x1xf32>
    %35 = vector.extract_strided_slice %32 {offsets = [16, 0], sizes = [8, 1], strides = [1, 1]} : vector<24x1xf32> to vector<8x1xf32>
    %36 = arith.maximumf %33, %34 : vector<8x1xf32>
    %37 = arith.maximumf %36, %35 : vector<8x1xf32>
    %38 = arith.subf %33, %37 : vector<8x1xf32>
    %39 = math.exp %38 : vector<8x1xf32>
    %40 = arith.subf %34, %37 : vector<8x1xf32>
    %41 = math.exp %40 : vector<8x1xf32>
    %42 = arith.subf %35, %37 : vector<8x1xf32>
    %43 = math.exp %42 : vector<8x1xf32>
    %44 = arith.addf %39, %41 : vector<8x1xf32>
    %45 = arith.addf %44, %43 : vector<8x1xf32>
    %46 = tpu.reciprocal %45 {approx = true} : vector<8x1xf32> -> vector<8x1xf32>
    %47 = arith.mulf %45, %46 : vector<8x1xf32>
    %cst_29 = arith.constant 2.000000e+00 : f32
    %48 = vector.broadcast %cst_29 : f32 to vector<8x1xf32>
    %49 = arith.subf %48, %47 : vector<8x1xf32>
    %50 = arith.mulf %46, %49 : vector<8x1xf32>
    %51 = arith.mulf %39, %50 : vector<8x1xf32>
    %52 = arith.mulf %41, %50 : vector<8x1xf32>
    %53 = arith.mulf %43, %50 : vector<8x1xf32>
    %54 = vector.broadcast %51 : vector<8x1xf32> to vector<8x128xf32>
    %55 = arith.mulf %54, %5 : vector<8x128xf32>
    %56 = vector.broadcast %52 : vector<8x1xf32> to vector<8x128xf32>
    %57 = arith.mulf %56, %11 : vector<8x128xf32>
    %58 = arith.addf %55, %57 : vector<8x128xf32>
    %59 = vector.broadcast %53 : vector<8x1xf32> to vector<8x128xf32>
    %60 = arith.mulf %59, %17 : vector<8x128xf32>
    %61 = arith.addf %58, %60 : vector<8x128xf32>
    %c0_30 = arith.constant 0 : index
    %c0_31 = arith.constant 0 : index
    %62 = vector.load %arg14[%c0_30, %c0_31] : memref<128x128xf32, #tpu.memory_space<vmem>>, vector<128x128xf32>
    %cst_32 = arith.constant dense<0.000000e+00> : vector<8x128xf32>
    %63 = tpu.matmul %61, %62, %cst_32 {dimension_numbers = #tpu.dot_dimension_numbers<[1], [0], [0], [1], [0, 0, 1, 1], [], []>} : vector<8x128xf32>, vector<128x128xf32>, vector<8x128xf32> -> vector<8x128xf32>
    %c0_33 = arith.constant 0 : index
    %c0_34 = arith.constant 0 : index
    %64 = vector.load %arg15[%c0_33, %c0_34] : memref<1x128xf32, #tpu.memory_space<vmem>>, vector<1x128xf32>
    %65 = vector.broadcast %64 : vector<1x128xf32> to vector<8x128xf32>
    %66 = arith.addf %63, %65 : vector<8x128xf32>
    %cst_35 = arith.constant 0.000000e+00 : f32
    %67 = vector.broadcast %cst_35 : f32 to vector<8x128xf32>
    %68 = arith.maximumf %66, %67 : vector<8x128xf32>
    %c0_36 = arith.constant 0 : index
    %c0_37 = arith.constant 0 : index
    %69 = vector.load %arg16[%c0_36, %c0_37] : memref<128x128xf32, #tpu.memory_space<vmem>>, vector<128x128xf32>
    %cst_38 = arith.constant dense<0.000000e+00> : vector<8x128xf32>
    %70 = tpu.matmul %68, %69, %cst_38 {dimension_numbers = #tpu.dot_dimension_numbers<[1], [0], [0], [1], [0, 0, 1, 1], [], []>} : vector<8x128xf32>, vector<128x128xf32>, vector<8x128xf32> -> vector<8x128xf32>
    %c0_39 = arith.constant 0 : index
    %c0_40 = arith.constant 0 : index
    %71 = vector.load %arg17[%c0_39, %c0_40] : memref<1x128xf32, #tpu.memory_space<vmem>>, vector<1x128xf32>
    %72 = vector.broadcast %71 : vector<1x128xf32> to vector<8x128xf32>
    %73 = arith.addf %70, %72 : vector<8x128xf32>
    %c0_41 = arith.constant 0 : index
    %c0_42 = arith.constant 0 : index
    %74 = vector.load %arg18[%c0_41, %c0_42] : memref<8x128xf32, #tpu.memory_space<vmem>>, vector<8x128xf32>
    tpu.vector_store %arg18[%c0_41, %c0_42], %73 {strides = array<i32>} : memref<8x128xf32, #tpu.memory_space<vmem>>, vector<8x128xf32>,
    return
  }
  func.func @transform_0(%arg0: i32) -> (i32, i32) {
    %c0_i32 = arith.constant 0 : i32
    %c0_i32_0 = arith.constant 0 : i32
    return %arg0, %c0_i32 : i32, i32
  }
  func.func @transform_1(%arg0: i32) -> (i32, i32) {
    %c0_i32 = arith.constant 0 : i32
    %c0_i32_0 = arith.constant 0 : i32
    return %arg0, %c0_i32 : i32, i32
  }
  func.func @transform_2(%arg0: i32) -> (i32, i32) {
    %c0_i32 = arith.constant 0 : i32
    %c0_i32_0 = arith.constant 0 : i32
    return %arg0, %c0_i32 : i32, i32
  }
  func.func @transform_3(%arg0: i32) -> (i32, i32) {
    %c0_i32 = arith.constant 0 : i32
    %c0_i32_0 = arith.constant 0 : i32
    %c0_i32_1 = arith.constant 0 : i32
    return %c0_i32, %c0_i32_0 : i32, i32
  }
  func.func @transform_4(%arg0: i32) -> (i32, i32) {
    %c0_i32 = arith.constant 0 : i32
    %c0_i32_0 = arith.constant 0 : i32
    %c0_i32_1 = arith.constant 0 : i32
    return %c0_i32, %c0_i32_0 : i32, i32
  }
  func.func @transform_5(%arg0: i32) -> (i32, i32) {
    %c0_i32 = arith.constant 0 : i32
    %c0_i32_0 = arith.constant 0 : i32
    %c0_i32_1 = arith.constant 0 : i32
    return %c0_i32, %c0_i32_0 : i32, i32
  }
  func.func @transform_6(%arg0: i32) -> (i32, i32) {
    %c0_i32 = arith.constant 0 : i32
    %c0_i32_0 = arith.constant 0 : i32
    %c0_i32_1 = arith.constant 0 : i32
    return %c0_i32, %c0_i32_0 : i32, i32
  }
  func.func @transform_7(%arg0: i32) -> (i32, i32) {
    %c0_i32 = arith.constant 0 : i32
    %c0_i32_0 = arith.constant 0 : i32
    %c0_i32_1 = arith.constant 0 : i32
    return %c0_i32, %c0_i32_0 : i32, i32
  }
  func.func @transform_8(%arg0: i32) -> (i32, i32) {
    %c0_i32 = arith.constant 0 : i32
    %c0_i32_0 = arith.constant 0 : i32
    %c0_i32_1 = arith.constant 0 : i32
    return %c0_i32, %c0_i32_0 : i32, i32
  }
  func.func @transform_9(%arg0: i32) -> (i32, i32) {
    %c0_i32 = arith.constant 0 : i32
    %c0_i32_0 = arith.constant 0 : i32
    %c0_i32_1 = arith.constant 0 : i32
    return %c0_i32, %c0_i32_0 : i32, i32
  }
  func.func @transform_10(%arg0: i32) -> (i32, i32) {
    %c0_i32 = arith.constant 0 : i32
    %c0_i32_0 = arith.constant 0 : i32
    %c0_i32_1 = arith.constant 0 : i32
    return %c0_i32, %c0_i32_0 : i32, i32
  }
  func.func @transform_11(%arg0: i32) -> (i32, i32) {
    %c0_i32 = arith.constant 0 : i32
    %c0_i32_0 = arith.constant 0 : i32
    %c0_i32_1 = arith.constant 0 : i32
    return %c0_i32, %c0_i32_0 : i32, i32
  }
  func.func @transform_12(%arg0: i32) -> (i32, i32) {
    %c0_i32 = arith.constant 0 : i32
    %c0_i32_0 = arith.constant 0 : i32
    %c0_i32_1 = arith.constant 0 : i32
    return %c0_i32, %c0_i32_0 : i32, i32
  }
  func.func @transform_13(%arg0: i32) -> (i32, i32) {
    %c0_i32 = arith.constant 0 : i32
    %c0_i32_0 = arith.constant 0 : i32
    %c0_i32_1 = arith.constant 0 : i32
    return %c0_i32, %c0_i32_0 : i32, i32
  }
  func.func @transform_14(%arg0: i32) -> (i32, i32) {
    %c0_i32 = arith.constant 0 : i32
    %c0_i32_0 = arith.constant 0 : i32
    %c0_i32_1 = arith.constant 0 : i32
    return %c0_i32, %c0_i32_0 : i32, i32
  }
  func.func @transform_15(%arg0: i32) -> (i32, i32) {
    %c0_i32 = arith.constant 0 : i32
    %c0_i32_0 = arith.constant 0 : i32
    %c0_i32_1 = arith.constant 0 : i32
    return %c0_i32, %c0_i32_0 : i32, i32
  }
  func.func @transform_16(%arg0: i32) -> (i32, i32) {
    %c0_i32 = arith.constant 0 : i32
    %c0_i32_0 = arith.constant 0 : i32
    %c0_i32_1 = arith.constant 0 : i32
    return %c0_i32, %c0_i32_0 : i32, i32
  }
  func.func @transform_17(%arg0: i32) -> (i32, i32) {
    %c0_i32 = arith.constant 0 : i32
    %c0_i32_0 = arith.constant 0 : i32
    return %arg0, %c0_i32 : i32, i32
  }
}

</mosaic_0001>

<bundles_post_ra>
// kernel: tpu_custom_call.1
= control target key start
LH: loop header
LB: loop body
LE: loop exit
PB: predicated region body
PF: predicated region fallthrough
CT: control target
= control target key end

     0   :  { %s1708_s0 = inlined_call_operand.hbm [shape: f32[8,128], index: 0, kind: input, shape index: {}]   ;;  %s1709_s1 = inlined_call_operand.hbm [shape: f32[8,128], index: 1, kind: input, shape index: {}]   ;;  %s1710_s2 = inlined_call_operand.hbm [shape: f32[8,128], index: 2, kind: input, shape index: {}]   ;;  %s1711_s3 = inlined_call_operand.hbm [shape: f32[128,128], index: 3, kind: input, shape index: {}]   ;;  %s1712_s4 = inlined_call_operand.vmem [shape: f32[1,128], index: 4, kind: input, shape index: {}]   ;;  %s1713_s5 = inlined_call_operand.hbm [shape: f32[128,128], index: 5, kind: input, shape index: {}]   ;;  %s1714_s6 = inlined_call_operand.vmem [shape: f32[1,128], index: 6, kind: input, shape index: {}]   ;;  %s1715_s7 = inlined_call_operand.hbm [shape: f32[128,128], index: 7, kind: input, shape index: {}]   ;;  %s1716_s8 = inlined_call_operand.vmem [shape: f32[1,128], index: 8, kind: input, shape index: {}]   ;;  %s1717_s9 = inlined_call_operand.hbm [shape: f32[128,128], index: 9, kind: input, shape index: {}]   ;;  %s1718_s10 = inlined_call_operand.vmem [shape: f32[1,128], index: 10, kind: input, shape index: {}]   ;;  %s1719_s11 = inlined_call_operand.vmem [shape: f32[1,128], index: 11, kind: input, shape index: {}]   ;;  %s1720_s12 = inlined_call_operand.<no memory space> [shape: f32[1,1], index: 12, kind: input, shape index: {}]   ;;  %s1721_s13 = inlined_call_operand.hbm [shape: f32[128,128], index: 13, kind: input, shape index: {}]   ;;  %s1722_s14 = inlined_call_operand.vmem [shape: f32[1,128], index: 14, kind: input, shape index: {}]   ;;  %s1723_s15 = inlined_call_operand.hbm [shape: f32[128,128], index: 15, kind: input, shape index: {}]   ;;  %s1724_s16 = inlined_call_operand.vmem [shape: f32[1,128], index: 16, kind: input, shape index: {}]   ;;  %s1725_s17 = inlined_call_operand.hbm [shape: f32[8,128], index: 17, kind: output, shape index: {}]  }
   0x1   :  { %1726 = sst [smem:[#allocation25_spill]] %s1708_s0  ;;  %v22_v0 = vstv %s1720_s12 }
   0x2   :  { %1727 = sst [smem:[#allocation26_spill]] %s1709_s1  ;;  %23 = vst [vmem:[#allocation2] sm:$0x1] %v22_v0 }
   0x3   :  { %24 = vsyncpa [#allocation4], 0 }
   0x4   :  { %25 = vsyncpa [#allocation7], 0 }
   0x5   :  { %26 = vsyncpa [#allocation10], 0 }
   0x6   :  { %27 = vsyncpa [#allocation13], 0 }
   0x7   :  { %28 = vsyncpa [#allocation16], 0 }
   0x8   :  { %29 = vsyncpa [#allocation5], 0  ;;  %s1407_s26 = smov [#allocation6]   ;;  %s1408_s28 = smov [#allocation9]  }
   0x9   :  { %s46_s27 = sshll.u32 %s1407_s26, 4  ;;  %s65_s29 = sshll.u32 %s1408_s28, 4  ;;  %s47_s27 = int_to_ptr.vmem [resolvable:$true] %s46_s27  ;;  %s66_s29 = int_to_ptr.vmem [resolvable:$true] %s65_s29 }
   0xa   :  { %s1203_s0 = scalar_lea.vmem %s47_s27, 128  ;;  %p1208_p1 = scmp.lt.s32.totalorder %s47_s27, %s47_s27 }
   0xb   :  { %p1204_p0 = scmp.ne.s32.totalorder %s47_s27, %s1203_s0  ;;  %p1209_p2 = scmp.lt.s32.totalorder %s1203_s0, %s1203_s0 }
   0xd   :  { %p1210_p3 = por %p1209_p2, %p1208_p1 }
   0xf   :  { %p1211_p4 = pnand %p1210_p3, %p1204_p0 }
  0x11   :  { %1214 = shalt.err (!%p1211_p4)
}
  0x12   :  { %s1728_s18 = sld [smem:[#allocation26_spill]]  ;;  %s1223_s19 = scalar_lea.vmem %s66_s29, 2048 }
  0x13   :  { %p1224_p5 = scmp.ne.s32.totalorder %s66_s29, %s1223_s19  ;;  %p1228_p6 = scmp.lt.s32.totalorder %s66_s29, %s66_s29 }
  0x14   :  { %p1229_p7 = scmp.lt.s32.totalorder %s1223_s19, %s1223_s19 }
  0x16   :  { %p1230_p8 = por %p1229_p7, %p1228_p6 }
  0x18   :  { %49 = dma.hbm_to_vmem [thread:$0]  %s1728_s18, 128, %s47_s27, [#allocation7]  }
  0x19   :  { %p1231_p9 = pnand %p1230_p8, %p1224_p5 }
  0x1b   :  { %1234 = shalt.err (!%p1231_p9)
}
  0x1c   :  { %s1409_s1 = smov 128   ;;  %s1410_s20 = smov 8  }
  0x1d   :  { %71 = dma.hbm_to_vmem [thread:$0]  %s1711_s3, 2048, %s66_s29, [#allocation10], %s1409_s1, %s1409_s1, %s1410_s20  }
  0x1e   :  { %s1411_s23 = smov [#allocation12]   ;;  %s1412_s25 = smov [#allocation15]  }
  0x1f   :  { %s93_s24 = sshll.u32 %s1411_s23, 4  ;;  %s125_s26 = sshll.u32 %s1412_s25, 4  ;;  %s94_s24 = int_to_ptr.vmem [resolvable:$true] %s93_s24  ;;  %s126_s26 = int_to_ptr.vmem [resolvable:$true] %s125_s26 }
  0x20   :  { %s1243_s27 = scalar_lea.vmem %s94_s24, 2048  ;;  %p1248_p11 = scmp.lt.s32.totalorder %s94_s24, %s94_s24 }
  0x21   :  { %p1244_p10 = scmp.ne.s32.totalorder %s94_s24, %s1243_s27  ;;  %p1249_p12 = scmp.lt.s32.totalorder %s1243_s27, %s1243_s27 }
  0x23   :  { %p1250_p13 = por %p1249_p12, %p1248_p11 }
  0x25   :  { %p1251_p0 = pnand %p1250_p13, %p1244_p10 }
  0x27   :  { %1254 = shalt.err (!%p1251_p0)
}
  0x28   :  { %99 = dma.hbm_to_vmem [thread:$0]  %s1715_s7, 2048, %s94_s24, [#allocation13], %s1409_s1, %s1409_s1, %s1410_s20  }
  0x29   :  { %s1263_s3 = scalar_lea.vmem %s126_s26, 2048  ;;  %p1268_p2 = scmp.lt.s32.totalorder %s126_s26, %s126_s26 }
  0x2a   :  { %p1264_p1 = scmp.ne.s32.totalorder %s126_s26, %s1263_s3  ;;  %p1269_p3 = scmp.lt.s32.totalorder %s1263_s3, %s1263_s3 }
  0x2c   :  { %p1270_p4 = por %p1269_p3, %p1268_p2 }
  0x2e   :  { %p1271_p5 = pnand %p1270_p4, %p1264_p1 }
  0x30   :  { %1274 = shalt.err (!%p1271_p5)
}
  0x31   :  { %131 = dma.hbm_to_vmem [thread:$0]  %s1721_s13, 2048, %s126_s26, [#allocation16], %s1409_s1, %s1409_s1, %s1410_s20  }
  0x32   :  { %s1413_s30 = smov [#allocation3]   ;;  %s1414_s19 = smov [#allocation8]  }
  0x33   :  { %s36_s18 = sshll.u32 %s1413_s30, 4  ;;  %s56_s21 = sshll.u32 %s1414_s19, 4  ;;  %s37_s18 = int_to_ptr.vmem [resolvable:$true] %s36_s18  ;;  %s57_s21 = int_to_ptr.vmem [resolvable:$true] %s56_s21 }
  0x34   :  { %s1283_s7 = scalar_lea.vmem %s37_s18, 128  ;;  %p1288_p7 = scmp.lt.s32.totalorder %s37_s18, %s37_s18 }
  0x35   :  { %p1284_p6 = scmp.ne.s32.totalorder %s37_s18, %s1283_s7  ;;  %p1289_p8 = scmp.lt.s32.totalorder %s1283_s7, %s1283_s7 }
  0x37   :  { %p1290_p9 = por %p1289_p8, %p1288_p7 }
  0x39   :  { %p1291_p10 = pnand %p1290_p9, %p1284_p6 }
  0x3b   :  { %1294 = shalt.err (!%p1291_p10)
}
  0x3c   :  { %s1729_s24 = sld [smem:[#allocation25_spill]]  ;;  %s1303_s25 = scalar_lea.vmem %s57_s21, 128 }
  0x3d   :  { %p1304_p11 = scmp.ne.s32.totalorder %s57_s21, %s1303_s25  ;;  %p1308_p12 = scmp.lt.s32.totalorder %s57_s21, %s57_s21 }
  0x3e   :  { %p1309_p13 = scmp.lt.s32.totalorder %s1303_s25, %s1303_s25 }
  0x40   :  { %p1310_p0 = por %p1309_p13, %p1308_p12 }
  0x42   :  { %39 = dma.hbm_to_vmem [thread:$0]  %s1729_s24, 128, %s37_s18, [#allocation4]  }
  0x43   :  { %p1311_p1 = pnand %p1310_p0, %p1304_p11 }
  0x45   :  { %1314 = shalt.err (!%p1311_p1)
}
  0x46   :  { %59 = dma.hbm_to_vmem [thread:$0]  %s1710_s2, 128, %s57_s21, [#allocation7]  }
  0x47   :  { %s1415_s27 = smov [#allocation11]   ;;  %s1416_s0 = smov [#allocation14]  }
  0x48   :  { %s79_s28 = sshll.u32 %s1415_s27, 4  ;;  %s107_s3 = sshll.u32 %s1416_s0, 4  ;;  %s80_s28 = int_to_ptr.vmem [resolvable:$true] %s79_s28  ;;  %s108_s3 = int_to_ptr.vmem [resolvable:$true] %s107_s3 }
  0x49   :  { %s1323_s29 = scalar_lea.vmem %s80_s28, 2048  ;;  %p1328_p3 = scmp.lt.s32.totalorder %s80_s28, %s80_s28 }
  0x4a   :  { %p1324_p2 = scmp.ne.s32.totalorder %s80_s28, %s1323_s29  ;;  %p1329_p4 = scmp.lt.s32.totalorder %s1323_s29, %s1323_s29 }
  0x4c   :  { %p1330_p5 = por %p1329_p4, %p1328_p3 }
  0x4e   :  { %p1331_p6 = pnand %p1330_p5, %p1324_p2 }
  0x50   :  { %1334 = shalt.err (!%p1331_p6)
}
  0x51   :  { %85 = dma.hbm_to_vmem [thread:$0]  %s1713_s5, 2048, %s80_s28, [#allocation10], %s1409_s1, %s1409_s1, %s1410_s20  }
  0x52   :  { %s1343_s2 = scalar_lea.vmem %s108_s3, 2048  ;;  %p1348_p8 = scmp.lt.s32.totalorder %s108_s3, %s108_s3 }
  0x53   :  { %p1344_p7 = scmp.ne.s32.totalorder %s108_s3, %s1343_s2  ;;  %p1349_p9 = scmp.lt.s32.totalorder %s1343_s2, %s1343_s2 }
  0x55   :  { %p1350_p10 = por %p1349_p9, %p1348_p8 }
  0x57   :  { %p1351_p11 = pnand %p1350_p10, %p1344_p7 }
  0x59   :  { %1354 = shalt.err (!%p1351_p11)
}
  0x5a   :  { %113 = dma.hbm_to_vmem [thread:$0]  %s1717_s9, 2048, %s108_s3, [#allocation13], %s1409_s1, %s1409_s1, %s1410_s20  }
  0x5b   :  { %s1417_s21 = smov [#allocation17]  }
  0x5c   :  { %s139_s7 = sshll.u32 %s1417_s21, 4  ;;  %s140_s7 = int_to_ptr.vmem [resolvable:$true] %s139_s7 }
  0x5d   :  { %s1363_s22 = scalar_lea.vmem %s140_s7, 2048  ;;  %p1368_p13 = scmp.lt.s32.totalorder %s140_s7, %s140_s7 }
  0x5e   :  { %p1364_p12 = scmp.ne.s32.totalorder %s140_s7, %s1363_s22  ;;  %p1369_p0 = scmp.lt.s32.totalorder %s1363_s22, %s1363_s22 }
  0x60   :  { %p1370_p1 = por %p1369_p0, %p1368_p13 }
  0x62   :  { %p1371_p2 = pnand %p1370_p1, %p1364_p12 }
  0x64   :  { %1374 = shalt.err (!%p1371_p2)
}
  0x65   :  { %145 = dma.hbm_to_vmem [thread:$0]  %s1723_s15, 2048, %s140_s7, [#allocation16], %s1409_s1, %s1409_s1, %s1410_s20  }
  0x66   :  { %1395 = dma.done.wait [#allocation4], 128  }
  0x67   :  { %1396 = vsyncadd [#allocation4], 4294967168 }
  0x68   :  { %1397 = dma.done.wait [#allocation7], 256  }
  0x69   :  { %1398 = vsyncadd [#allocation7], 4294967040 }
  0x6a   :  { %1399 = dma.done.wait [#allocation10], 4096  }
  0x6b   :  { %1400 = vsyncadd [#allocation10], 4294963200 }
  0x6c   :  { %1401 = dma.done.wait [#allocation13], 4096  }
  0x6d   :  { %1402 = vsyncadd [#allocation13], 4294963200 }
  0x6e   :  { %1403 = dma.done.wait [#allocation16], 4096  }
  0x6f   :  { %1404 = vsyncadd [#allocation16], 4294963200  ;;  %v1418_v1 = vmov 0.0   ;;  %vm1419_vm0 = vmmov 0   ;;  %v191_v2 = vld [vmem:[#allocation9 + $0x78] sm:$0xff]  ;;  %v190_v3 = vld [vmem:[#allocation9 + $0x70] sm:$0xff] }
  0x70   :  { %948 = vmatprep.subr.mxu0 %v1418_v1  ;;  %983 = vmatprep.subr.mxu1 %v1418_v1  ;;  %v285_v4 = vld [vmem:[#allocation11 + $0x78] sm:$0xff]  ;;  %v284_v5 = vld [vmem:[#allocation11 + $0x70] sm:$0xff]  ;;  %v189_v6 = vld [vmem:[#allocation9 + $0x68] sm:$0xff]  ;;  %s1421_s28 = smov [#allocation18]  }
  0x71   :  { %980 = vmatprep.mubr.msk.f32.mxu0 %vm1419_vm0, %v1418_v1  ;;  %1015 = vmatprep.mubr.msk.f32.mxu1 %vm1419_vm0, %v1418_v1  ;;  %v283_v7 = vld [vmem:[#allocation11 + $0x68] sm:$0xff]  ;;  %v188_v8 = vld [vmem:[#allocation9 + $0x60] sm:$0xff]  ;;  %v187_v10 = vld [vmem:[#allocation9 + $0x58] sm:$0xff]  ;;  %s823_s0 = sshll.u32 %s1421_s28, 4  ;;  %s824_s0 = int_to_ptr.vmem [resolvable:$true] %s823_s0 }
  0x72   :  { %949 = vmatpush3.msra.mxu0 %v191_v2  ;;  %984 = vmatpush3.msra.mxu1 %v285_v4  ;;  %v282_v9 = vld [vmem:[#allocation11 + $0x60] sm:$0xff]  ;;  %v281_v11 = vld [vmem:[#allocation11 + $0x58] sm:$0xff]  ;;  %v186_v12 = vld [vmem:[#allocation9 + $0x50] sm:$0xff]  ;;  %s1375_s3 = scalar_lea.vmem %s824_s0, 128  ;;  %p1380_p4 = scmp.lt.s32.totalorder %s824_s0, %s824_s0 }
  0x73   :  { %950 = vmatprep.subr.mxu0 %v1418_v1  ;;  %985 = vmatprep.subr.mxu1 %v1418_v1  ;;  %v280_v13 = vld [vmem:[#allocation11 + $0x50] sm:$0xff]  ;;  %v185_v14 = vld [vmem:[#allocation9 + $0x48] sm:$0xff]  ;;  %v184_v16 = vld [vmem:[#allocation9 + $0x40] sm:$0xff]  ;;  %p1376_p3 = scmp.ne.s32.totalorder %s824_s0, %s1375_s3  ;;  %p1381_p5 = scmp.lt.s32.totalorder %s1375_s3, %s1375_s3 }
  0x74   :  { %951 = vmatpush3.msra.mxu0 %v190_v3  ;;  %986 = vmatpush3.msra.mxu1 %v284_v5  ;;  %v279_v15 = vld [vmem:[#allocation11 + $0x48] sm:$0xff]  ;;  %v278_v17 = vld [vmem:[#allocation11 + $0x40] sm:$0xff]  ;;  %v183_v18 = vld [vmem:[#allocation9 + $0x38] sm:$0xff] }
  0x75   :  { %952 = vmatprep.subr.mxu0 %v1418_v1  ;;  %987 = vmatprep.subr.mxu1 %v1418_v1  ;;  %v277_v19 = vld [vmem:[#allocation11 + $0x38] sm:$0xff]  ;;  %v182_v20 = vld [vmem:[#allocation9 + $0x30] sm:$0xff]  ;;  %v181_v22 = vld [vmem:[#allocation9 + $0x28] sm:$0xff]  ;;  %p1382_p6 = por %p1381_p5, %p1380_p4 }
  0x76   :  { %953 = vmatpush3.msra.mxu0 %v189_v6  ;;  %988 = vmatpush3.msra.mxu1 %v283_v7  ;;  %v276_v21 = vld [vmem:[#allocation11 + $0x30] sm:$0xff]  ;;  %v275_v23 = vld [vmem:[#allocation11 + $0x28] sm:$0xff]  ;;  %v180_v24 = vld [vmem:[#allocation9 + $0x20] sm:$0xff] }
  0x77   :  { %954 = vmatprep.subr.mxu0 %v1418_v1  ;;  %989 = vmatprep.subr.mxu1 %v1418_v1  ;;  %v274_v25 = vld [vmem:[#allocation11 + $0x20] sm:$0xff]  ;;  %v179_v26 = vld [vmem:[#allocation9 + $0x18] sm:$0xff]  ;;  %v178_v28 = vld [vmem:[#allocation9 + $0x10] sm:$0xff]  ;;  %p1383_p7 = pnand %p1382_p6, %p1376_p3 }
  0x78   :  { %955 = vmatpush3.msra.mxu0 %v188_v8  ;;  %990 = vmatpush3.msra.mxu1 %v282_v9  ;;  %v273_v27 = vld [vmem:[#allocation11 + $0x18] sm:$0xff]  ;;  %v272_v29 = vld [vmem:[#allocation11 + $0x10] sm:$0xff]  ;;  %v177_v30 = vld [vmem:[#allocation9 + $0x8] sm:$0xff] }
  0x79   :  { %956 = vmatprep.subr.mxu0 %v1418_v1  ;;  %991 = vmatprep.subr.mxu1 %v1418_v1  ;;  %v271_v31 = vld [vmem:[#allocation11 + $0x8] sm:$0xff]  ;;  %v176_v32 = vld [vmem:[#allocation9] sm:$0xff]  ;;  %v379_v34 = vld [vmem:[#allocation12 + $0x78] sm:$0xff] }
  0x7a   :  { %957 = vmatpush3.msra.mxu0 %v187_v10  ;;  %992 = vmatpush3.msra.mxu1 %v281_v11  ;;  %v175_v33 = vld [vmem:[#allocation3] sm:$0xff]  ;;  %v270_v35 = vld [vmem:[#allocation11] sm:$0xff]  ;;  %v269_v36 = vld [vmem:[#allocation6] sm:$0xff] }
  0x7b   :  { %958 = vmatprep.subr.mxu0 %v1418_v1  ;;  %993 = vmatprep.subr.mxu1 %v1418_v1  ;;  %v378_v37 = vld [vmem:[#allocation12 + $0x70] sm:$0xff]  ;;  %v377_v38 = vld [vmem:[#allocation12 + $0x68] sm:$0xff]  ;;  %v472_v39 = vld [vmem:[#allocation14 + $0x78] sm:$0xff] }
  0x7c   :  { %959 = vmatpush3.msra.mxu0 %v186_v12  ;;  %994 = vmatpush3.msra.mxu1 %v280_v13  ;;  %v376_v40 = vld [vmem:[#allocation12 + $0x60] sm:$0xff]  ;;  %v471_v41 = vld [vmem:[#allocation14 + $0x70] sm:$0xff]  ;;  %v375_v42 = vld [vmem:[#allocation12 + $0x58] sm:$0xff] }
  0x7d   :  { %960 = vmatprep.subr.mxu0 %v1418_v1  ;;  %995 = vmatprep.subr.mxu1 %v1418_v1  ;;  %v470_v43 = vld [vmem:[#allocation14 + $0x68] sm:$0xff]  ;;  %v374_v44 = vld [vmem:[#allocation12 + $0x50] sm:$0xff]  ;;  %v469_v45 = vld [vmem:[#allocation14 + $0x60] sm:$0xff] }
  0x7e   :  { %961 = vmatpush3.msra.mxu0 %v185_v14  ;;  %996 = vmatpush3.msra.mxu1 %v279_v15  ;;  %v373_v46 = vld [vmem:[#allocation12 + $0x48] sm:$0xff]  ;;  %v468_v47 = vld [vmem:[#allocation14 + $0x58] sm:$0xff]  ;;  %v372_v48 = vld [vmem:[#allocation12 + $0x40] sm:$0xff] }
  0x7f   :  { %962 = vmatprep.subr.mxu0 %v1418_v1  ;;  %997 = vmatprep.subr.mxu1 %v1418_v1  ;;  %v467_v49 = vld [vmem:[#allocation14 + $0x50] sm:$0xff]  ;;  %v371_v50 = vld [vmem:[#allocation12 + $0x38] sm:$0xff]  ;;  %v466_v51 = vld [vmem:[#allocation14 + $0x48] sm:$0xff] }
  0x80   :  { %963 = vmatpush3.msra.mxu0 %v184_v16  ;;  %998 = vmatpush3.msra.mxu1 %v278_v17  ;;  %v370_v52 = vld [vmem:[#allocation12 + $0x30] sm:$0xff]  ;;  %v465_v53 = vld [vmem:[#allocation14 + $0x40] sm:$0xff]  ;;  %v369_v54 = vld [vmem:[#allocation12 + $0x28] sm:$0xff] }
  0x81   :  { %964 = vmatprep.subr.mxu0 %v1418_v1  ;;  %999 = vmatprep.subr.mxu1 %v1418_v1  ;;  %v464_v55 = vld [vmem:[#allocation14 + $0x38] sm:$0xff]  ;;  %v368_v56 = vld [vmem:[#allocation12 + $0x20] sm:$0xff]  ;;  %v463_v57 = vld [vmem:[#allocation14 + $0x30] sm:$0xff] }
  0x82   :  { %965 = vmatpush3.msra.mxu0 %v183_v18  ;;  %1000 = vmatpush3.msra.mxu1 %v277_v19  ;;  %v367_v58 = vld [vmem:[#allocation12 + $0x18] sm:$0xff]  ;;  %v462_v59 = vld [vmem:[#allocation14 + $0x28] sm:$0xff]  ;;  %v366_v60 = vld [vmem:[#allocation12 + $0x10] sm:$0xff] }
  0x83   :  { %966 = vmatprep.subr.mxu0 %v1418_v1  ;;  %1001 = vmatprep.subr.mxu1 %v1418_v1  ;;  %v461_v61 = vld [vmem:[#allocation14 + $0x20] sm:$0xff]  ;;  %v365_v62 = vld [vmem:[#allocation12 + $0x8] sm:$0xff]  ;;  %v460_v63 = vld [vmem:[#allocation14 + $0x18] sm:$0xff] }
  0x84   :  { %967 = vmatpush3.msra.mxu0 %v182_v20  ;;  %1002 = vmatpush3.msra.mxu1 %v276_v21  ;;  %v364_v0 = vld [vmem:[#allocation12] sm:$0xff]  ;;  %v459_v2 = vld [vmem:[#allocation14 + $0x10] sm:$0xff]  ;;  %v363_v3 = vld [vmem:[#allocation8] sm:$0xff] }
  0x85   :  { %968 = vmatprep.subr.mxu0 %v1418_v1  ;;  %1003 = vmatprep.subr.mxu1 %v1418_v1  ;;  %v458_v4 = vld [vmem:[#allocation14 + $0x8] sm:$0xff]  ;;  %v457_v5 = vld [vmem:[#allocation14] sm:$0xff] }
  0x86   :  { %969 = vmatpush3.msra.mxu0 %v181_v22  ;;  %1004 = vmatpush3.msra.mxu1 %v275_v23  ;;  %v836_v6 = vld [vmem:[%s1712_s4] ss:$0 sm:$0xff] }
  0x87   :  { %970 = vmatprep.subr.mxu0 %v1418_v1  ;;  %1005 = vmatprep.subr.mxu1 %v1418_v1  ;;  %v837_v8 = vld [vmem:[%s1714_s6] ss:$0 sm:$0xff] }
  0x88   :  { %971 = vmatpush3.msra.mxu0 %v180_v24  ;;  %1006 = vmatpush3.msra.mxu1 %v274_v25  ;;  %v838_v14 = vld [vmem:[%s1716_s8] ss:$0 sm:$0xff] }
  0x89   :  { %972 = vmatprep.subr.mxu0 %v1418_v1  ;;  %1007 = vmatprep.subr.mxu1 %v1418_v1  ;;  %v839_v18 = vld [vmem:[%s1718_s10] ss:$0 sm:$0xff] }
  0x8a   :  { %973 = vmatpush3.msra.mxu0 %v179_v26  ;;  %1008 = vmatpush3.msra.mxu1 %v273_v27  ;;  %v840_v25 = vld [vmem:[%s1719_s11] ss:$0 sm:$0xff] }
  0x8b   :  { %974 = vmatprep.subr.mxu0 %v1418_v1  ;;  %1009 = vmatprep.subr.mxu1 %v1418_v1 }
  0x8c   :  { %975 = vmatpush3.msra.mxu0 %v178_v28  ;;  %1010 = vmatpush3.msra.mxu1 %v272_v29 }
  0x8d   :  { %976 = vmatprep.subr.mxu0 %v1418_v1  ;;  %1011 = vmatprep.subr.mxu1 %v1418_v1 }
  0x8e   :  { %977 = vmatpush3.msra.mxu0 %v177_v30  ;;  %1012 = vmatpush3.msra.mxu1 %v271_v31 }
  0x8f   :  { %978 = vmatprep.subr.mxu0 %v1418_v1  ;;  %1013 = vmatprep.subr.mxu1 %v1418_v1 }
  0x90   :  { %979 = vmatpush3.msra.mxu0 %v176_v32  ;;  %1014 = vmatpush3.msra.mxu1 %v270_v35  ;;  %v1420_v35 = vmov 0  }
  0x91   :  { %981 = vmatmul.mubr.f32.vlgmr.msra.gmra.mxu0 %v175_v33  ;;  %1018 = vmatprep.subr.mxu0 %v1418_v1 }
  0x92   :  { %1019 = vmatpush3.msra.mxu0 %v379_v34  ;;  %1016 = vmatmul.mubr.f32.vlgmr.msra.gmra.mxu1 %v269_v36  ;;  %v644_v36 = vld [vmem:[#allocation15 + $0x78] sm:$0xff] }
  0x93   :  { %1020 = vmatprep.subr.mxu0 %v1418_v1  ;;  %1050 = vmatprep.mubr.msk.f32.mxu0 %vm1419_vm0, %v1418_v1 }
  0x94   :  { %1021 = vmatpush3.msra.mxu0 %v378_v37  ;;  %1053 = vmatprep.subr.mxu1 %v1418_v1  ;;  %v643_v37 = vld [vmem:[#allocation15 + $0x70] sm:$0xff] }
  0x95   :  { %1022 = vmatprep.subr.mxu0 %v1418_v1  ;;  %1054 = vmatpush3.msra.mxu1 %v472_v39  ;;  %v641_v39 = vld [vmem:[#allocation15 + $0x60] sm:$0xff] }
  0x96   :  { %1023 = vmatpush3.msra.mxu0 %v377_v38  ;;  %1055 = vmatprep.subr.mxu1 %v1418_v1  ;;  %v642_v38 = vld [vmem:[#allocation15 + $0x68] sm:$0xff] }
  0x97   :  { %1024 = vmatprep.subr.mxu0 %v1418_v1  ;;  %1056 = vmatpush3.msra.mxu1 %v471_v41  ;;  %v639_v41 = vld [vmem:[#allocation15 + $0x50] sm:$0xff] }
  0x98   :  { %1025 = vmatpush3.msra.mxu0 %v376_v40  ;;  %1057 = vmatprep.subr.mxu1 %v1418_v1  ;;  %v640_v40 = vld [vmem:[#allocation15 + $0x58] sm:$0xff] }
  0x99   :  { %1026 = vmatprep.subr.mxu0 %v1418_v1  ;;  %1058 = vmatpush3.msra.mxu1 %v470_v43  ;;  %v637_v43 = vld [vmem:[#allocation15 + $0x40] sm:$0xff] }
  0x9a   :  { %1027 = vmatpush3.msra.mxu0 %v375_v42  ;;  %1059 = vmatprep.subr.mxu1 %v1418_v1  ;;  %v638_v42 = vld [vmem:[#allocation15 + $0x48] sm:$0xff] }
  0x9b   :  { %1028 = vmatprep.subr.mxu0 %v1418_v1  ;;  %1060 = vmatpush3.msra.mxu1 %v469_v45  ;;  %v635_v45 = vld [vmem:[#allocation15 + $0x30] sm:$0xff] }
  0x9c   :  { %1029 = vmatpush3.msra.mxu0 %v374_v44  ;;  %1061 = vmatprep.subr.mxu1 %v1418_v1  ;;  %v636_v44 = vld [vmem:[#allocation15 + $0x38] sm:$0xff] }
  0x9d   :  { %1030 = vmatprep.subr.mxu0 %v1418_v1  ;;  %1062 = vmatpush3.msra.mxu1 %v468_v47  ;;  %v633_v47 = vld [vmem:[#allocation15 + $0x20] sm:$0xff] }
  0x9e   :  { %1031 = vmatpush3.msra.mxu0 %v373_v46  ;;  %1063 = vmatprep.subr.mxu1 %v1418_v1  ;;  %v634_v46 = vld [vmem:[#allocation15 + $0x28] sm:$0xff] }
  0x9f   :  { %1032 = vmatprep.subr.mxu0 %v1418_v1  ;;  %1064 = vmatpush3.msra.mxu1 %v467_v49 }
  0xa0   :  { %1033 = vmatpush3.msra.mxu0 %v372_v48  ;;  %1065 = vmatprep.subr.mxu1 %v1418_v1 }
  0xa1   :  { %1034 = vmatprep.subr.mxu0 %v1418_v1  ;;  %1066 = vmatpush3.msra.mxu1 %v466_v51 }
  0xa2   :  { %1035 = vmatpush3.msra.mxu0 %v371_v50  ;;  %1067 = vmatprep.subr.mxu1 %v1418_v1  ;;  %v841_v50 = vld [vmem:[#allocation2] ss:$0 sm:$0xff] }
  0xa3   :  { %1036 = vmatprep.subr.mxu0 %v1418_v1  ;;  %1068 = vmatpush3.msra.mxu1 %v465_v53 }
  0xa4   :  { %1037 = vmatpush3.msra.mxu0 %v370_v52  ;;  %1069 = vmatprep.subr.mxu1 %v1418_v1 }
  0xa5   :  { %1038 = vmatprep.subr.mxu0 %v1418_v1  ;;  %1070 = vmatpush3.msra.mxu1 %v464_v55 }
  0xa6   :  { %1039 = vmatpush3.msra.mxu0 %v369_v54  ;;  %1071 = vmatprep.subr.mxu1 %v1418_v1 }
  0xa7   :  { %1040 = vmatprep.subr.mxu0 %v1418_v1  ;;  %1072 = vmatpush3.msra.mxu1 %v463_v57 }
  0xa8   :  { %1041 = vmatpush3.msra.mxu0 %v368_v56  ;;  %1073 = vmatprep.subr.mxu1 %v1418_v1 }
  0xa9   :  { %1042 = vmatprep.subr.mxu0 %v1418_v1  ;;  %1074 = vmatpush3.msra.mxu1 %v462_v59 }
  0xaa   :  { %1043 = vmatpush3.msra.mxu0 %v367_v58  ;;  %1075 = vmatprep.subr.mxu1 %v1418_v1 }
  0xab   :  { %1044 = vmatprep.subr.mxu0 %v1418_v1  ;;  %1076 = vmatpush3.msra.mxu1 %v461_v61 }
  0xac   :  { %1045 = vmatpush3.msra.mxu0 %v366_v60  ;;  %1077 = vmatprep.subr.mxu1 %v1418_v1 }
  0xad   :  { %1046 = vmatprep.subr.mxu0 %v1418_v1  ;;  %1078 = vmatpush3.msra.mxu1 %v460_v63 }
  0xae   :  { %1047 = vmatpush3.msra.mxu0 %v365_v62  ;;  %1079 = vmatprep.subr.mxu1 %v1418_v1 }
  0xaf   :  { %1048 = vmatprep.subr.mxu0 %v1418_v1  ;;  %1080 = vmatpush3.msra.mxu1 %v459_v2 }
  0xb0   :  { %1049 = vmatpush3.msra.mxu0 %v364_v0  ;;  %1081 = vmatprep.subr.mxu1 %v1418_v1 }
  0xb1   :  { %1051 = vmatmul.mubr.f32.vlgmr.msra.gmra.mxu0 %v363_v3  ;;  %1085 = vmatprep.mubr.msk.f32.mxu1 %vm1419_vm0, %v1418_v1 }
  0xb2   :  { %1094 = vmatprep.subr.mxu0 %v1418_v1  ;;  %1126 = vmatprep.mubr.msk.f32.mxu0 %vm1419_vm0, %v1418_v1 }
  0xb3   :  { %1082 = vmatpush3.msra.mxu1 %v458_v4  ;;  %1180 = vset.pattern.permute.xlu0 %v1420_v35 }
  0xb4   :  { %1083 = vmatprep.subr.mxu1 %v1418_v1  ;;  %1179 = vset.pattern.permute.xlu1 %v1420_v35 }
  0xb5   :  { %1084 = vmatpush3.msra.mxu1 %v457_v5  ;;  %1095 = vmatpush3.msra.mxu0 %v644_v36 }
  0xb6   :  { %1129 = vmatprep.subr.mxu1 %v1418_v1  ;;  %1096 = vmatprep.subr.mxu0 %v1418_v1 }
  0xb7   :  { %1097 = vmatpush3.msra.mxu0 %v643_v37 }
  0xb8   :  { %1098 = vmatprep.subr.mxu0 %v1418_v1 }
  0xb9   :  { %1099 = vmatpush3.msra.mxu0 %v642_v38 }
  0xba   :  { %1100 = vmatprep.subr.mxu0 %v1418_v1 }
  0xbb   :  { %1101 = vmatpush3.msra.mxu0 %v641_v39 }
  0xbc   :  { %1102 = vmatprep.subr.mxu0 %v1418_v1 }
  0xbd   :  { %1103 = vmatpush3.msra.mxu0 %v640_v40  ;;  %v725_v40 = vld [vmem:[#allocation17 + $0x10] sm:$0xff] }
  0xbe   :  { %1104 = vmatprep.subr.mxu0 %v1418_v1 }
  0xbf   :  { %1105 = vmatpush3.msra.mxu0 %v639_v41  ;;  %v724_v41 = vld [vmem:[#allocation17 + $0x8] sm:$0xff] }
  0xc0   :  { %1106 = vmatprep.subr.mxu0 %v1418_v1 }
  0xc1   :  { %1107 = vmatpush3.msra.mxu0 %v638_v42  ;;  %v723_v42 = vld [vmem:[#allocation17] sm:$0xff] }
  0xc2   :  { %1108 = vmatprep.subr.mxu0 %v1418_v1 }
  0xc3   :  { %1109 = vmatpush3.msra.mxu0 %v637_v43 }
  0xc4   :  { %1110 = vmatprep.subr.mxu0 %v1418_v1 }
  0xc5   :  { %1111 = vmatpush3.msra.mxu0 %v636_v44 }
  0xc6   :  { %1112 = vmatprep.subr.mxu0 %v1418_v1 }
  0xc7   :  { %1113 = vmatpush3.msra.mxu0 %v635_v45  ;;  %v843_v45 = vld [vmem:[%s1724_s16] ss:$0 sm:$0xff] }
  0xc8   :  { %1114 = vmatprep.subr.mxu0 %v1418_v1 }
  0xc9   :  { %1115 = vmatpush3.msra.mxu0 %v634_v46 }
  0xca   :  { %1116 = vmatprep.subr.mxu0 %v1418_v1 }
  0xcb   :  { %1117 = vmatpush3.msra.mxu0 %v633_v47 }
  0xcc   :  { %1118 = vmatprep.subr.mxu0 %v1418_v1 }
 0x151   :  { %v265_v7 = vpop.f32.mrf.mxu0 }
 0x152   :  { %v1642_v9 = vadd.f32 %v836_v6, %v265_v7  ;;  %v359_v11 = vpop.f32.mrf.mxu1 }
 0x153   :  { %v982_v10 = vpop.f32.mrf.mxu0  ;;  %v1645_v12 = vadd.f32 %v837_v8, %v359_v11 }
 0x154   :  { %1086 = vmatmul.mubr.f32.vlgmr.msra.gmra.mxu1 %v1642_v9  ;;  %v1017_v13 = vpop.f32.mrf.mxu1  ;;  %v632_v10 = vld [vmem:[#allocation15 + $0x18] sm:$0xff] }
 0x155   :  { %1088 = vmatprep.mubr.msk.f32.mxu1 %vm1419_vm0, %v1418_v1  ;;  %1119 = vmatpush3.msra.mxu0 %v632_v10 }
 0x156   :  { %1120 = vmatprep.subr.mxu0 %v1418_v1 }
 0x158   :  { %1089 = vmatmul.mubr.f32.gmra.mxu1 %v1645_v12 }
 0x159   :  { %1091 = vmatprep.mubr.msk.f32.mxu1 %vm1419_vm0, %v1418_v1 }
 0x171   :  { %v453_v15 = vpop.f32.mrf.mxu0 }
 0x172   :  { %v1655_v16 = vadd.f32 %v838_v14, %v453_v15  ;;  %v631_v14 = vld [vmem:[#allocation15 + $0x10] sm:$0xff]  ;;  %v630_v15 = vld [vmem:[#allocation15 + $0x8] sm:$0xff] }
 0x173   :  { %v1052_v17 = vpop.f32.mrf.mxu0  ;;  %1121 = vmatpush3.msra.mxu0 %v631_v14 }
 0x174   :  { %1092 = vmatmul.mubr.f32.gmra.mxu1 %v1655_v16  ;;  %1122 = vmatprep.subr.mxu0 %v1418_v1 }
 0x175   :  { %1161 = vmatprep.mubr.msk.f32.mxu1 %vm1419_vm0, %v1418_v1  ;;  %1123 = vmatpush3.msra.mxu0 %v630_v15 }
 0x176   :  { %1124 = vmatprep.subr.mxu0 %v1418_v1 }
 0x214   :  { %v546_v19 = vpop.f32.mrf.mxu1 }
 0x215   :  { %v547_v20 = vadd.f32 %v839_v18, %v546_v19  ;;  %v738_v19 = vld [vmem:[#allocation17 + $0x78] sm:$0xff] }
 0x216   :  { %v1087_v21 = vpop.f32.mrf.mxu1  ;;  %1130 = vmatpush3.msra.mxu1 %v738_v19 }
 0x217   :  { %1181 = vtanh.f32 %v547_v20  ;;  %v737_v20 = vld [vmem:[#allocation17 + $0x70] sm:$0xff]  ;;  %1131 = vmatprep.subr.mxu1 %v1418_v1  ;;  %v736_v21 = vld [vmem:[#allocation17 + $0x68] sm:$0xff] }
 0x218   :  { %v551_v22 = vpop.f32.mrf.mxu1  ;;  %1132 = vmatpush3.msra.mxu1 %v737_v20 }
 0x219   :  { %v552_v23 = vadd.f32 %v839_v18, %v551_v22  ;;  %1133 = vmatprep.subr.mxu1 %v1418_v1  ;;  %v735_v22 = vld [vmem:[#allocation17 + $0x60] sm:$0xff] }
 0x21a   :  { %v1090_v24 = vpop.f32.mrf.mxu1  ;;  %1134 = vmatpush3.msra.mxu1 %v736_v21 }
 0x21b   :  { %1183 = vtanh.f32 %v552_v23  ;;  %1135 = vmatprep.subr.mxu1 %v1418_v1  ;;  %v734_v23 = vld [vmem:[#allocation17 + $0x58] sm:$0xff]  ;;  %v733_v24 = vld [vmem:[#allocation17 + $0x50] sm:$0xff] }
 0x21c   :  { %1136 = vmatpush3.msra.mxu1 %v735_v22 }
 0x21d   :  { %1137 = vmatprep.subr.mxu1 %v1418_v1 }
 0x21e   :  { %1138 = vmatpush3.msra.mxu1 %v734_v23 }
 0x21f   :  { %1139 = vmatprep.subr.mxu1 %v1418_v1 }
 0x220   :  { %1140 = vmatpush3.msra.mxu1 %v733_v24 }
 0x221   :  { %1141 = vmatprep.subr.mxu1 %v1418_v1 }
 0x224   :  { %v1182_v26 = vpop.eup %1181 }
 0x225   :  { %v570_v27 = vmul.f32 %v1182_v26, %v840_v25  ;;  %v731_v26 = vld [vmem:[#allocation17 + $0x40] sm:$0xff] }
 0x227   :  { %573 = vadd.xlane.f32.xlu0 %v570_v27  ;;  %v730_v27 = vld [vmem:[#allocation17 + $0x38] sm:$0xff] }
 0x228   :  { %v1184_v28 = vpop.eup %1183 }
 0x229   :  { %v571_v29 = vmul.f32 %v1184_v28, %v840_v25  ;;  %v729_v28 = vld [vmem:[#allocation17 + $0x30] sm:$0xff] }
 0x22b   :  { %575 = vadd.xlane.f32.xlu0 %v571_v29  ;;  %v728_v29 = vld [vmem:[#allocation17 + $0x28] sm:$0xff] }
 0x234   :  { %v556_v30 = vpop.f32.mrf.mxu1 }
 0x235   :  { %v557_v31 = vadd.f32 %v839_v18, %v556_v30  ;;  %v629_v18 = vld [vmem:[#allocation15] sm:$0xff] }
 0x236   :  { %v1093_v32 = vpop.f32.mrf.mxu1  ;;  %1125 = vmatpush3.msra.mxu0 %v629_v18  ;;  %v727_v30 = vld [vmem:[#allocation17 + $0x20] sm:$0xff] }
 0x237   :  { %1185 = vtanh.f32 %v557_v31  ;;  %v726_v31 = vld [vmem:[#allocation17 + $0x18] sm:$0xff] }
 0x244   :  { %v1186_v33 = vpop.eup %1185 }
 0x245   :  { %v572_v34 = vmul.f32 %v1186_v33, %v840_v25  ;;  %v732_v25 = vld [vmem:[#allocation17 + $0x48] sm:$0xff] }
 0x246   :  { %1142 = vmatpush3.msra.mxu1 %v732_v25 }
 0x247   :  { %577 = vadd.xlane.f32.xlu1 %v572_v34  ;;  %1143 = vmatprep.subr.mxu1 %v1418_v1 }
 0x248   :  { %1144 = vmatpush3.msra.mxu1 %v731_v26 }
 0x249   :  { %1145 = vmatprep.subr.mxu1 %v1418_v1 }
 0x24a   :  { %1146 = vmatpush3.msra.mxu1 %v730_v27 }
 0x24b   :  { %1147 = vmatprep.subr.mxu1 %v1418_v1 }
 0x24c   :  { %1148 = vmatpush3.msra.mxu1 %v729_v28 }
 0x24d   :  { %1149 = vmatprep.subr.mxu1 %v1418_v1 }
 0x24e   :  { %1150 = vmatpush3.msra.mxu1 %v728_v29 }
 0x24f   :  { %1151 = vmatprep.subr.mxu1 %v1418_v1 }
 0x250   :  { %1152 = vmatpush3.msra.mxu1 %v727_v30 }
 0x251   :  { %1153 = vmatprep.subr.mxu1 %v1418_v1 }
 0x252   :  { %1154 = vmatpush3.msra.mxu1 %v726_v31 }
 0x253   :  { %1155 = vmatprep.subr.mxu1 %v1418_v1 }
 0x254   :  { %1156 = vmatpush3.msra.mxu1 %v725_v40 }
 0x255   :  { %1157 = vmatprep.subr.mxu1 %v1418_v1 }
 0x256   :  { %1158 = vmatpush3.msra.mxu1 %v724_v41 }
 0x257   :  { %1159 = vmatprep.subr.mxu1 %v1418_v1 }
 0x258   :  { %1160 = vmatpush3.msra.mxu1 %v723_v42 }
 0x2b0   :  { %v574_v48 = vpop.xlane.xlu0 %573 }
 0x2b1   :  { %v586_v52 = vadd.f32 %v841_v50, %v574_v48 }
 0x2b4   :  { %v576_v49 = vpop.xlane.xlu0 %575 }
 0x2b5   :  { %v587_v51 = vadd.f32 %v841_v50, %v576_v49 }
 0x2b7   :  { %v589_v54 = vmax.f32 %v586_v52, %v587_v51 }
 0x2d0   :  { %v578_v53 = vpop.xlane.xlu1 %577 }
 0x2d1   :  { %v588_v55 = vadd.f32 %v841_v50, %v578_v53 }
 0x2d3   :  { %v590_v56 = vmax.f32 %v589_v54, %v588_v55 }
 0x2d5   :  { %v591_v57 = vsub.f32 %v586_v52, %v590_v56  ;;  %v594_v58 = vsub.f32 %v587_v51, %v590_v56  ;;  %v597_v59 = vsub.f32 %v588_v55, %v590_v56 }
 0x2d7   :  { %v592_v60 = vmul.f32 1.442695, %v591_v57  ;;  %v595_v61 = vmul.f32 1.442695, %v594_v58  ;;  %v598_v62 = vmul.f32 1.442695, %v597_v59 }
 0x2d9   :  { %1187 = vpow2.f32 %v592_v60 }
 0x2da   :  { %1189 = vpow2.f32 %v595_v61 }
 0x2db   :  { %1191 = vpow2.f32 %v598_v62 }
 0x2e6   :  { %v1188_v63 = vpop.eup %1187 }
 0x2e7   :  { %v1190_v0 = vpop.eup %1189 }
 0x2e8   :  { %v600_v2 = vadd.f32 %v1190_v0, %v1188_v63  ;;  %v1192_v3 = vpop.eup %1191 }
 0x2ea   :  { %v601_v4 = vadd.f32 %v1192_v3, %v600_v2 }
 0x2ec   :  { %1193 = vrcp.f32 %v601_v4 }
 0x2f9   :  { %v1194_v5 = vpop.eup %1193 }
 0x2fa   :  { %v603_v6 = vmul.f32 %v1194_v5, %v601_v4 }
 0x2fc   :  { %v604_v7 = vsub.f32 2.0, %v603_v6 }
 0x2fe   :  { %v605_v8 = vmul.f32 %v1194_v5, %v604_v7 }
 0x300   :  { %v607_v11 = vmul.f32 %v1190_v0, %v605_v8  ;;  %v606_v13 = vmul.f32 %v1188_v63, %v605_v8  ;;  %v608_v17 = vmul.f32 %v1192_v3, %v605_v8 }
 0x302   :  { %617 = vperm.xlu0 %1180, %v607_v11   ;;  %611 = vperm.xlu1 %1179, %v606_v13  }
 0x306   :  { %624 = vperm.xlu1 %1179, %v608_v17  }
 0x37d   :  { %v618_v32 = vpop.permute.xlu0 %617  ;;  %v612_v33 = vpop.permute.xlu1 %611 }
 0x37e   :  { %v620_v34 = vmul.f32 %v618_v32, %v1645_v12  ;;  %v614_v35 = vmul.f32 %v612_v33, %v1642_v9  ;;  %v842_v9 = vld [vmem:[%s1722_s14] ss:$0 sm:$0xff] }
 0x380   :  { %v621_v37 = vadd.f32 %v620_v34, %v614_v35 }
 0x381   :  { %v625_v36 = vpop.permute.xlu1 %624 }
 0x382   :  { %v627_v38 = vmul.f32 %v625_v36, %v1655_v16 }
 0x384   :  { %v628_v39 = vadd.f32 %v627_v38, %v621_v37 }
 0x386   :  { %1127 = vmatmul.mubr.f32.vlgmr.msra.gmra.mxu0 %v628_v39 }
 0x446   :  { %v718_v12 = vpop.f32.mrf.mxu0 }
 0x447   :  { %v719_v43 = vadd.f32 %v842_v9, %v718_v12 }
 0x448   :  { %v1128_v44 = vpop.f32.mrf.mxu0 }
 0x449   :  { %v722_v16 = vmax.f32 %v719_v43, 0.0 }
 0x44b   :  { %1162 = vmatmul.mubr.f32.vlgmr.msra.gmra.mxu1 %v722_v16 }
 0x50b   :  { %v812_v46 = vpop.f32.mrf.mxu1 }
 0x50c   :  { %v813_v47 = vadd.f32 %v843_v45, %v812_v46 }
 0x50d   :  { %v1163_v1 = vpop.f32.mrf.mxu1 }
 0x50e   :  { %816 = vst [vmem:[#allocation18] sm:$0xff] %v813_v47 }
 0x50f   :  { %1386 = shalt.err (!%p1383_p7)
}
 0x510   :  { %826 = dma.vmem_to_hbm [thread:$0]  %s824_s0, 128, %s1725_s17, [#allocation5]  }
 0x511   :  { %1405 = dma.done.wait [#allocation5], 128  }
 0x512   :  { %1406 = vsyncadd [#allocation5], 4294967168 }
 0x513   :  { %830 = vsyncpa [#allocation4], 1 }
 0x514   :  { %831 = vsyncpa [#allocation7], 1 }
 0x515   :  { %832 = vsyncpa [#allocation10], 1 }
 0x516   :  { %833 = vsyncpa [#allocation13], 1 }
 0x517   :  { %834 = vsyncpa [#allocation16], 1 }
 0x518   :  { %835 = vsyncpa [#allocation5], 1 }

</bundles_post_ra>
